<compile_context>
chip_gen: v7x
topology: tpu7x:2x2x1
jax: 0.10.0
libtpu: 0.0.40
codegen_flags: <defaults>
</compile_context>

<pallas_src>
import jax
import jax.numpy as jnp
from jax.experimental import pallas as pl
from jax.experimental.pallas import tpu as pltpu


_LANE_CAP = 32768  # lanes per block before we start stacking rows


def _round_up(x, m):
    return ((x + m - 1) // m) * m


def _round_down(x, m):
    return (x // m) * m


def _per_generation_budget():
    """Returns (per-block byte target, vmem_limit_bytes) tuned per TPU gen."""
    kind = ""
    try:
        kind = jax.devices()[0].device_kind.lower()
    except Exception:
        pass
    if "v5 lite" in kind or "v5e" in kind or "v5lite" in kind:
        # ~820 GB/s HBM: 2 MiB blocks already amortize the ~0.35us step cost.
        return 2 << 20, 32 << 20
    if "v7" in kind or "7x" in kind:
        # ~3.2 TB/s HBM but only 64 MiB VMEM/TC: big blocks, stay <= ~48 MiB.
        return 7 << 20, 48 << 20
    if "v6" in kind:
        # ~1.4 TB/s HBM, 128 MiB VMEM: 4 MiB blocks, plenty of headroom.
        return 4 << 20, 64 << 20
    return 4 << 20, 64 << 20  # default: v6-like sizing


def _choose_tiles(R, L, itemsize, target_bytes):
    """Lane-dense (tm, tl) block with tm % sublane == 0, tl % 128 == 0."""
    sub = max(8, 32 // itemsize)          # 8 for f32, 16 for bf16, 32 for int8
    lp = _round_up(L, 128)
    r_max = _round_up(R, sub)

    tl = min(lp, _LANE_CAP)
    tm = max(sub, min(r_max, _round_down(target_bytes // (tl * itemsize), sub)))
    if tm >= r_max:
        tm = r_max
        # Rows exhausted: widen lanes to keep filling the per-block budget.
        tl = max(tl, min(lp, _round_down(target_bytes // (tm * itemsize), 128)))
    return tm, tl


def _make_kernel(tm):
    def kernel(x_ref, mean_ref, inv_ref, o_ref):
        # Row-scalar tables are fully resident in VMEM; slice this block's rows.
        r0 = pl.multiple_of(pl.program_id(0) * tm, 8)
        mean = mean_ref[pl.ds(r0, tm), :]          # (tm, 1) f32
        inv = inv_ref[pl.ds(r0, tm), :]            # (tm, 1) f32, = 1/std
        x = x_ref[...].astype(jnp.float32)
        o_ref[...] = ((x - mean) * inv).astype(o_ref.dtype)
    return kernel


def _normalize_2d(x2d, row_mean, row_inv_std):
    """x2d: (R, L). row_mean/row_inv_std: (R, 1) float32. Returns (R, L)."""
    R, L = x2d.shape
    itemsize = jnp.dtype(x2d.dtype).itemsize
    target_bytes, vmem_limit = _per_generation_budget()
    tm, tl = _choose_tiles(R, L, itemsize, target_bytes)

    n_r = -(-R // tm)
    n_l = -(-L // tl)
    rp = n_r * tm

    # Pad only the tiny (R, 1) scalar tables (O(N*C) bytes) so the resident
    # tables can be sliced in-bounds for the ragged last row block; the image
    # itself is never padded or copied.
    if rp != R:
        row_mean = jnp.pad(row_mean, ((0, rp - R), (0, 0)))
        row_inv_std = jnp.pad(row_inv_std, ((0, rp - R), (0, 0)),
                              constant_values=1.0)

    return pl.pallas_call(
        _make_kernel(tm),
        out_shape=jax.ShapeDtypeStruct((R, L), x2d.dtype),
        grid=(n_r, n_l),
        in_specs=[
            pl.BlockSpec((tm, tl), lambda i, j: (i, j)),   # image tile (ragged edges masked)
            pl.BlockSpec((rp, 1), lambda i, j: (0, 0)),    # resident per-row mean
            pl.BlockSpec((rp, 1), lambda i, j: (0, 0)),    # resident per-row 1/std
        ],
        out_specs=pl.BlockSpec((tm, tl), lambda i, j: (i, j)),
        compiler_params=pltpu.CompilerParams(
            dimension_semantics=("parallel", "parallel"),
            vmem_limit_bytes=vmem_limit),
        cost_estimate=pl.CostEstimate(
            flops=2 * R * L,
            transcendentals=0,
            bytes_accessed=2 * R * L * itemsize + 2 * rp * 4),
    )(x2d, row_mean, row_inv_std)


class NormalizationPallas:
    """JAX/Pallas port of the PyTorch Normalization module."""

    def __init__(self, mean, std):
        mean = jnp.asarray(mean, jnp.float32).reshape(-1)
        std = jnp.asarray(std, jnp.float32).reshape(-1)
        # Mirrors mean.view(-1, 1, 1) / std.view(-1, 1, 1) in the PyTorch module.
        self.mean = mean.reshape(-1, 1, 1)
        self.std = std.reshape(-1, 1, 1)
        self._mean_flat = mean
        self._inv_std_flat = 1.0 / std      # precomputed once (perf feedback)

    def __call__(self, img):
        squeeze_batch = False
        if img.ndim == 3:                   # (C, H, W)
            img = img[None]
            squeeze_batch = True
        if img.ndim != 4:
            raise ValueError(f"expected (N,C,H,W) or (C,H,W), got {img.shape}")
        N, C, H, W = img.shape
        if C != self._mean_flat.shape[0]:
            raise ValueError("channel mismatch between img and mean/std")

        x2d = img.reshape(N * C, H * W)
        # Tiny (N*C, 1) per-row scalar tables; lane broadcast happens in-kernel.
        row_mean = jnp.tile(self._mean_flat, N).reshape(N * C, 1)
        row_inv = jnp.tile(self._inv_std_flat, N).reshape(N * C, 1)

        out = _normalize_2d(x2d, row_mean, row_inv).reshape(N, C, H, W)
        if squeeze_batch:
            out = out[0]
        return out


if __name__ == "__main__":
    key = jax.random.PRNGKey(0)
    k1, k2, k3, k4, k5 = jax.random.split(key, 5)

    # Test 1: small aligned NCHW shapes: batch=2, channels=4, spatial 16x16.
    N, C, H, W = 2, 4, 16, 16
    img = jax.random.normal(k1, (N, C, H, W), dtype=jnp.float32)
    mean = jax.random.normal(k2, (C,), dtype=jnp.float32) * 0.1
    std = jax.random.uniform(k3, (C,), minval=0.5, maxval=1.5, dtype=jnp.float32)

    module = NormalizationPallas(mean, std)
    out = module(img)
    jax.block_until_ready(out)
    ref = (img - mean.reshape(1, C, 1, 1)) / std.reshape(1, C, 1, 1)
    assert out.shape == img.shape
    assert jnp.allclose(out, ref, rtol=1e-5, atol=1e-5), float(
        jnp.max(jnp.abs(out - ref)))

    # Test 2: 3-D (C,H,W) path with ImageNet stats — ragged rows (3 < 8).
    img3 = jax.random.normal(k4, (3, 16, 16), dtype=jnp.float32)
    module3 = NormalizationPallas(
        jnp.array([0.485, 0.456, 0.406], jnp.float32),
        jnp.array([0.229, 0.224, 0.225], jnp.float32))
    out3 = module3(img3)
    jax.block_until_ready(out3)
    ref3 = (img3 - module3.mean) / module3.std
    assert out3.shape == img3.shape
    assert jnp.allclose(out3, ref3, rtol=1e-5, atol=1e-5)

    # Test 3: unaligned spatial dim (H*W = 225, not a multiple of 128) —
    # exercises the masked ragged-lane edge path with no host-side padding.
    img4 = jax.random.normal(k5, (2, 3, 15, 15), dtype=jnp.float32)
    out4 = module3(img4)
    jax.block_until_ready(out4)
    ref4 = (img4 - module3.mean[None]) / module3.std[None]
    assert out4.shape == img4.shape
    assert jnp.allclose(out4, ref4, rtol=1e-5, atol=1e-5)

    print("KERNEL_OK")
</pallas_src>

<mosaic_0001>
module attributes {stable_mosaic.version = 11 : i64} {
  func.func @kernel(%arg0: i32, %arg1: i32, %arg2: memref<8x256xf32, #tpu.memory_space<vmem>>, %arg3: memref<8x1xf32, #tpu.memory_space<vmem>>, %arg4: memref<8x1xf32, #tpu.memory_space<vmem>>, %arg5: memref<8x256xf32, #tpu.memory_space<vmem>>) attributes {dimension_semantics = [#tpu.dimension_semantics<parallel>, #tpu.dimension_semantics<parallel>], iteration_bounds = array<i64: 1, 1>, scalar_prefetch = 0 : i64, scratch_operands = 0 : i64, tpu.core_type = #tpu.core_type<tc>, window_params = [{transform_indices = @transform_0, window_bounds = array<i64: 8, 256>}, {pipeline_mode = #tpu.pipeline_mode<synchronous>, transform_indices = @transform_1, window_bounds = array<i64: 8, 1>}, {pipeline_mode = #tpu.pipeline_mode<synchronous>, transform_indices = @transform_2, window_bounds = array<i64: 8, 1>}, {transform_indices = @transform_3, window_bounds = array<i64: 8, 256>}]} {
    %c8_i32 = arith.constant 8 : i32
    %0 = arith.muli %arg0, %c8_i32 : i32
    %1 = tpu.assume_multiple %0, 8 : i32
    %2 = arith.index_cast %1 : i32 to index
    %c0 = arith.constant 0 : index
    %3 = vector.load %arg3[%2, %c0] : memref<8x1xf32, #tpu.memory_space<vmem>>, vector<8x1xf32>
    %4 = arith.index_cast %1 : i32 to index
    %c0_0 = arith.constant 0 : index
    %5 = vector.load %arg4[%4, %c0_0] : memref<8x1xf32, #tpu.memory_space<vmem>>, vector<8x1xf32>
    %c0_1 = arith.constant 0 : index
    %c0_2 = arith.constant 0 : index
    %6 = vector.load %arg2[%c0_1, %c0_2] : memref<8x256xf32, #tpu.memory_space<vmem>>, vector<8x256xf32>
    %7 = vector.broadcast %3 : vector<8x1xf32> to vector<8x256xf32>
    %8 = arith.subf %6, %7 : vector<8x256xf32>
    %9 = vector.broadcast %5 : vector<8x1xf32> to vector<8x256xf32>
    %10 = arith.mulf %8, %9 : vector<8x256xf32>
    %c0_3 = arith.constant 0 : index
    %c0_4 = arith.constant 0 : index
    %11 = vector.load %arg5[%c0_3, %c0_4] : memref<8x256xf32, #tpu.memory_space<vmem>>, vector<8x256xf32>
    tpu.vector_store %arg5[%c0_3, %c0_4], %10 {strides = array<i32>} : memref<8x256xf32, #tpu.memory_space<vmem>>, vector<8x256xf32>,
    return
  }
  func.func @transform_0(%arg0: i32, %arg1: i32) -> (i32, i32) {
    %c0_i32 = arith.constant 0 : i32
    return %arg0, %arg1 : i32, i32
  }
  func.func @transform_1(%arg0: i32, %arg1: i32) -> (i32, i32) {
    %c0_i32 = arith.constant 0 : i32
    %c0_i32_0 = arith.constant 0 : i32
    %c0_i32_1 = arith.constant 0 : i32
    return %c0_i32, %c0_i32_0 : i32, i32
  }
  func.func @transform_2(%arg0: i32, %arg1: i32) -> (i32, i32) {
    %c0_i32 = arith.constant 0 : i32
    %c0_i32_0 = arith.constant 0 : i32
    %c0_i32_1 = arith.constant 0 : i32
    return %c0_i32, %c0_i32_0 : i32, i32
  }
  func.func @transform_3(%arg0: i32, %arg1: i32) -> (i32, i32) {
    %c0_i32 = arith.constant 0 : i32
    return %arg0, %arg1 : i32, i32
  }
}

</mosaic_0001>

<bundles_post_ra>
// kernel: tpu_custom_call.1
= control target key start
LH: loop header
LB: loop body
LE: loop exit
PB: predicated region body
PF: predicated region fallthrough
CT: control target
= control target key end

     0   :  { %8 = vsyncpa [#allocation3], 0  ;;  %s262_s0 = inlined_call_operand.hbm [shape: f32[8,256], index: 0, kind: input, shape index: {}]   ;;  %s263_s1 = inlined_call_operand.hbm [shape: f32[8,1], index: 1, kind: input, shape index: {}]   ;;  %s264_s2 = inlined_call_operand.hbm [shape: f32[8,1], index: 2, kind: input, shape index: {}]   ;;  %s265_s3 = inlined_call_operand.hbm [shape: f32[8,256], index: 3, kind: output, shape index: {}]  }
   0x1   :  { %9 = vsyncpa [#allocation6], 0 }
   0x2   :  { %10 = vsyncpa [#allocation4], 0  ;;  %s189_s12 = smov [#allocation5]   ;;  %s190_s14 = smov [#allocation2]  }
   0x3   :  { %s27_s13 = sshll.u32 %s189_s12, 4  ;;  %s17_s15 = sshll.u32 %s190_s14, 4  ;;  %s28_s13 = int_to_ptr.vmem [resolvable:$true] %s27_s13  ;;  %s18_s15 = int_to_ptr.vmem [resolvable:$true] %s17_s15 }
   0x4   :  { %s95_s18 = scalar_lea.hbm %s263_s1, 128 }
   0x5   :  { %p96_p0 = scmp.ne.s32.totalorder %s263_s1, %s95_s18  ;;  %p99_p1 = scmp.lt.u32.totalorder %s95_s18, %s263_s1 }
   0x7   :  { %p101_p2 = pnand %p99_p1, %p96_p0 }
   0x9   :  { %104 = shalt.err (!%p101_p2)
}
   0xa   :  { %s105_s23 = scalar_lea.vmem %s28_s13, 128  ;;  %p110_p4 = scmp.lt.s32.totalorder %s28_s13, %s28_s13 }
   0xb   :  { %p106_p3 = scmp.ne.s32.totalorder %s28_s13, %s105_s23  ;;  %p111_p5 = scmp.lt.s32.totalorder %s105_s23, %s105_s23 }
   0xd   :  { %p112_p6 = por %p111_p5, %p110_p4 }
   0xf   :  { %p113_p7 = pnand %p112_p6, %p106_p3 }
  0x11   :  { %116 = shalt.err (!%p113_p7)
}
  0x12   :  { %30 = dma.hbm_to_vmem [thread:$0]  %s263_s1, 128, %s28_s13, [#allocation6]  }
  0x13   :  { %s117_s28 = scalar_lea.hbm %s262_s0, 256 }
  0x14   :  { %p118_p8 = scmp.ne.s32.totalorder %s262_s0, %s117_s28  ;;  %p121_p9 = scmp.lt.u32.totalorder %s117_s28, %s262_s0 }
  0x16   :  { %p123_p10 = pnand %p121_p9, %p118_p8 }
  0x18   :  { %126 = shalt.err (!%p123_p10)
}
  0x19   :  { %s127_s6 = scalar_lea.vmem %s18_s15, 256  ;;  %p132_p12 = scmp.lt.s32.totalorder %s18_s15, %s18_s15 }
  0x1a   :  { %p128_p11 = scmp.ne.s32.totalorder %s18_s15, %s127_s6  ;;  %p133_p13 = scmp.lt.s32.totalorder %s127_s6, %s127_s6 }
  0x1c   :  { %p134_p0 = por %p133_p13, %p132_p12 }
  0x1e   :  { %p135_p1 = pnand %p134_p0, %p128_p11 }
  0x20   :  { %138 = shalt.err (!%p135_p1)
}
  0x21   :  { %20 = dma.hbm_to_vmem [thread:$0]  %s262_s0, 256, %s18_s15, [#allocation3]  }
  0x22   :  { %s191_s8 = smov [#allocation7]   ;;  %s139_s12 = scalar_lea.hbm %s264_s2, 128 }
  0x23   :  { %s37_s9 = sshll.u32 %s191_s8, 4  ;;  %p140_p2 = scmp.ne.s32.totalorder %s264_s2, %s139_s12  ;;  %s38_s9 = int_to_ptr.vmem [resolvable:$true] %s37_s9 }
  0x24   :  { %p143_p3 = scmp.lt.u32.totalorder %s139_s12, %s264_s2 }
  0x26   :  { %p145_p4 = pnand %p143_p3, %p140_p2 }
  0x28   :  { %148 = shalt.err (!%p145_p4)
}
  0x29   :  { %s149_s18 = scalar_lea.vmem %s38_s9, 128  ;;  %p154_p6 = scmp.lt.s32.totalorder %s38_s9, %s38_s9 }
  0x2a   :  { %p150_p5 = scmp.ne.s32.totalorder %s38_s9, %s149_s18  ;;  %p155_p7 = scmp.lt.s32.totalorder %s149_s18, %s149_s18 }
  0x2c   :  { %p156_p8 = por %p155_p7, %p154_p6 }
  0x2e   :  { %p157_p9 = pnand %p156_p8, %p150_p5 }
  0x30   :  { %160 = shalt.err (!%p157_p9)
}
  0x31   :  { %40 = dma.hbm_to_vmem [thread:$0]  %s264_s2, 128, %s38_s9, [#allocation6]  }
  0x32   :  { %183 = dma.done.wait [#allocation3], 256  }
  0x33   :  { %184 = vsyncadd [#allocation3], 4294967040 }
  0x34   :  { %185 = dma.done.wait [#allocation6], 256  }
  0x35   :  { %186 = vsyncadd [#allocation6], 4294967040  ;;  %v192_v0 = vmov 0   ;;  %v52_v1 = vld [vmem:[#allocation5] sm:$0xff]  ;;  %v54_v2 = vld [vmem:[#allocation7] sm:$0xff]  ;;  %s193_s19 = smov [#allocation8]  }
  0x36   :  { %94 = vset.pattern.permute.xlu0 %v192_v0  ;;  %v55_v3 = vld [vmem:[#allocation2] sm:$0xff]  ;;  %v56_v4 = vld [vmem:[#allocation2 + $0x8] sm:$0xff]  ;;  %s79_s20 = sshll.u32 %s193_s19, 4  ;;  %s80_s20 = int_to_ptr.vmem [resolvable:$true] %s79_s20 }
  0x37   :  { %59 = vperm.xlu0 %94, %v52_v1   ;;  %s161_s2 = scalar_lea.vmem %s80_s20, 256  ;;  %p166_p11 = scmp.lt.s32.totalorder %s80_s20, %s80_s20 }
  0x38   :  { %p162_p10 = scmp.ne.s32.totalorder %s80_s20, %s161_s2  ;;  %p167_p12 = scmp.lt.s32.totalorder %s161_s2, %s161_s2 }
  0x3a   :  { %p168_p13 = por %p167_p12, %p166_p11 }
  0x3b   :  { %66 = vperm.xlu0 %94, %v54_v2  }
  0x3c   :  { %p169_p0 = pnand %p168_p13, %p162_p10 }
  0xb6   :  { %v60_v5 = vpop.permute.xlu0 %59 }
  0xb7   :  { %v62_v6 = vsub.f32 %v55_v3, %v60_v5  ;;  %v63_v7 = vsub.f32 %v56_v4, %v60_v5 }
  0xba   :  { %v67_v8 = vpop.permute.xlu0 %66 }
  0xbb   :  { %v69_v9 = vmul.f32 %v67_v8, %v62_v6  ;;  %v70_v10 = vmul.f32 %v67_v8, %v63_v7 }
  0xbd   :  { %71 = vst [vmem:[#allocation8] sm:$0xff] %v69_v9  ;;  %72 = vst [vmem:[#allocation8 + $0x8] sm:$0xff] %v70_v10 }
  0xbe   :  { %172 = shalt.err (!%p169_p0)
}
  0xbf   :  { %s173_s23 = scalar_lea.hbm %s265_s3, 256 }
  0xc0   :  { %p174_p1 = scmp.ne.s32.totalorder %s265_s3, %s173_s23  ;;  %p177_p2 = scmp.lt.u32.totalorder %s173_s23, %s265_s3 }
  0xc2   :  { %p179_p3 = pnand %p177_p2, %p174_p1 }
  0xc4   :  { %182 = shalt.err (!%p179_p3)
}
  0xc5   :  { %82 = dma.vmem_to_hbm [thread:$0]  %s80_s20, 256, %s265_s3, [#allocation4]  }
  0xc6   :  { %187 = dma.done.wait [#allocation4], 256  }
  0xc7   :  { %188 = vsyncadd [#allocation4], 4294967040 }
  0xc8   :  { %86 = vsyncpa [#allocation3], 1 }
  0xc9   :  { %87 = vsyncpa [#allocation6], 1 }
  0xca   :  { %88 = vsyncpa [#allocation4], 1 }

</bundles_post_ra>
